<compile_context>
chip_gen: v6e
topology: v6e:2x2x1
jax: 0.10.0
libtpu: 0.0.40
codegen_flags: <defaults>
</compile_context>

<pallas_src>
import math
import functools

import jax
import jax.numpy as jnp
from jax.experimental import pallas as pl
from jax.experimental.pallas import tpu as pltpu


def _round_up(n, m):
    return ((n + m - 1) // m) * m


def _ffn_kernel(x_ref, w1_ref, b1_ref, w2_ref, b2_ref, w3_ref, b3_ref, o_ref,
                *, mm_dtype):
    # ---- Linear(dim -> hidden_dim) ----
    x = x_ref[...].astype(mm_dtype)
    h = jnp.dot(x, w1_ref[...].astype(mm_dtype),
                preferred_element_type=jnp.float32)
    h = h + b1_ref[...].astype(jnp.float32)

    # ---- GELU (exact, erf-based; matches torch.nn.GELU default) in f32 ----
    h = 0.5 * h * (1.0 + jax.lax.erf(h * (1.0 / math.sqrt(2.0))))

    # Dropout(p=0.0) is identity — elided.

    # ---- Linear(hidden_dim -> dim) ----
    y = jnp.dot(h.astype(mm_dtype), w2_ref[...].astype(mm_dtype),
                preferred_element_type=jnp.float32)
    y = y + b2_ref[...].astype(jnp.float32)

    # ---- LayerNorm over last dim (eps=1e-5). Affine is folded into w3/b3. ----
    mean = jnp.mean(y, axis=-1, keepdims=True)
    c = y - mean
    var = jnp.mean(c * c, axis=-1, keepdims=True)
    y_norm = c * jax.lax.rsqrt(var + 1e-5)

    # ---- Linear(dim -> num_classes), lane-padded output width ----
    out = jnp.dot(y_norm.astype(mm_dtype), w3_ref[...].astype(mm_dtype),
                  preferred_element_type=jnp.float32)
    out = out + b3_ref[...].astype(jnp.float32)
    o_ref[...] = out.astype(o_ref.dtype)


def _vmem_budget_bytes(tile, dim, hidden_dim, out_pad):
    elt = 4  # f32 resident copies (upper bound even if mm_dtype is bf16)
    weights = (dim * hidden_dim + hidden_dim * dim + dim * out_pad) * elt
    biases = (hidden_dim + dim + out_pad) * elt
    io = 2 * tile * dim * elt + 2 * tile * out_pad * elt      # double-buffered in/out tiles
    interm = tile * hidden_dim * 4 + 2 * tile * dim * 4       # f32 GELU / LN intermediates
    need = 2 * (weights + biases) + io + interm               # assume weights double-buffered
    need = int(1.5 * need) + (2 << 20)                        # headroom
    # Clamp to something valid on every generation (v7x has 64 MiB VMEM per TC).
    return min(max(need, 16 << 20), 64 << 20)


def feed_forward_pallas(x, params, *, row_tile=128, mm_dtype=jnp.float32):
    """x: [batch, seq, dim]  ->  [batch, seq, num_classes]"""
    w1, b1, w2, b2, gamma, beta, w3, b3 = params
    batch, seq, dim = x.shape
    hidden_dim = w1.shape[1]
    num_classes = w3.shape[1]

    # Fold LayerNorm affine into the final Linear:
    #   (y_norm*gamma + beta) @ w3 + b3 == y_norm @ (gamma[:,None]*w3) + (beta @ w3 + b3)
    w3_f = gamma.astype(jnp.float32)[:, None] * w3.astype(jnp.float32)
    b3_f = beta.astype(jnp.float32) @ w3.astype(jnp.float32) + b3.astype(jnp.float32)

    # Lane-pad the classifier width to a multiple of 128 for unmasked stores.
    out_pad = _round_up(num_classes, 128)
    w3_p = jnp.zeros((dim, out_pad), jnp.float32).at[:, :num_classes].set(w3_f)
    b3_p = jnp.zeros((out_pad,), jnp.float32).at[:num_classes].set(b3_f)

    # Row tiling: large tiles to fill the MXU; pad the row axis so any row count works.
    rows = batch * seq
    tile = min(row_tile, _round_up(rows, 8))
    rows_p = _round_up(rows, tile)
    x2d = x.reshape(rows, dim)
    if rows_p != rows:
        x2d = jnp.pad(x2d, ((0, rows_p - rows), (0, 0)))

    # 2-D biases so they broadcast cleanly inside the kernel.
    b1_2d = b1.reshape(1, hidden_dim)
    b2_2d = b2.reshape(1, dim)
    b3_2d = b3_p.reshape(1, out_pad)

    grid = (rows_p // tile,)

    # Constant-index (resident) specs for weights/biases.
    full = lambda shape: pl.BlockSpec(shape, lambda i: (0, 0))

    kernel = functools.partial(_ffn_kernel, mm_dtype=mm_dtype)

    out2d = pl.pallas_call(
        kernel,
        out_shape=jax.ShapeDtypeStruct((rows_p, out_pad), x.dtype),
        grid_spec=pltpu.PrefetchScalarGridSpec(
            num_scalar_prefetch=0,
            grid=grid,
            in_specs=[
                pl.BlockSpec((tile, dim), lambda i: (i, 0)),   # x rows
                full((dim, hidden_dim)),                       # w1
                full((1, hidden_dim)),                         # b1
                full((hidden_dim, dim)),                       # w2
                full((1, dim)),                                # b2
                full((dim, out_pad)),                          # w3 (gamma-folded, lane-padded)
                full((1, out_pad)),                            # b3 (beta-folded, lane-padded)
            ],
            out_specs=pl.BlockSpec((tile, out_pad), lambda i: (i, 0)),
        ),
        compiler_params=pltpu.CompilerParams(
            dimension_semantics=("parallel",),
            vmem_limit_bytes=_vmem_budget_bytes(tile, dim, hidden_dim, out_pad),
        ),
    )(x2d, w1, b1_2d, w2, b2_2d, w3_p, b3_2d)

    return out2d[:rows, :num_classes].reshape(batch, seq, num_classes)


def init_params(key, dim, hidden_dim, num_classes, dtype=jnp.float32):
    """Deterministic init mimicking torch.nn.Linear default (uniform +-1/sqrt(fan_in))."""
    ks = jax.random.split(key, 6)

    def lin(kw, kb, fan_in, fan_out):
        bound = 1.0 / math.sqrt(fan_in)
        w = jax.random.uniform(kw, (fan_in, fan_out), dtype, -bound, bound)
        b = jax.random.uniform(kb, (fan_out,), dtype, -bound, bound)
        return w, b

    w1, b1 = lin(ks[0], ks[1], dim, hidden_dim)
    w2, b2 = lin(ks[2], ks[3], hidden_dim, dim)
    w3, b3 = lin(ks[4], ks[5], dim, num_classes)
    gamma = jnp.ones((dim,), dtype)
    beta = jnp.zeros((dim,), dtype)
    return (w1, b1, w2, b2, gamma, beta, w3, b3)


def feed_forward_ref(x, params):
    w1, b1, w2, b2, gamma, beta, w3, b3 = params
    h = x @ w1 + b1
    h = 0.5 * h * (1.0 + jax.lax.erf(h / math.sqrt(2.0)))
    y = h @ w2 + b2
    mean = jnp.mean(y, axis=-1, keepdims=True)
    var = jnp.mean((y - mean) ** 2, axis=-1, keepdims=True)
    y = (y - mean) * jax.lax.rsqrt(var + 1e-5) * gamma + beta
    return y @ w3 + b3


if __name__ == "__main__":
    batch, seq, dim, hidden_dim, num_classes = 2, 8, 32, 64, 7

    key = jax.random.PRNGKey(0)
    k_x, k_p = jax.random.split(key)
    x = jax.random.normal(k_x, (batch, seq, dim), jnp.float32)
    params = init_params(k_p, dim, hidden_dim, num_classes)

    out = feed_forward_pallas(x, params)
    out = jax.block_until_ready(out)

    ref = feed_forward_ref(x, params)
    assert out.shape == (batch, seq, num_classes)
    assert jnp.allclose(out, ref, atol=1e-4, rtol=1e-4), "mismatch vs reference"

    print("KERNEL_OK")
</pallas_src>

<mosaic_0001>
module attributes {stable_mosaic.version = 11 : i64} {
  func.func @_ffn_kernel(%arg0: i32, %arg1: memref<16x32xf32, #tpu.memory_space<vmem>>, %arg2: memref<32x64xf32, #tpu.memory_space<vmem>>, %arg3: memref<1x64xf32, #tpu.memory_space<vmem>>, %arg4: memref<64x32xf32, #tpu.memory_space<vmem>>, %arg5: memref<1x32xf32, #tpu.memory_space<vmem>>, %arg6: memref<32x128xf32, #tpu.memory_space<vmem>>, %arg7: memref<1x128xf32, #tpu.memory_space<vmem>>, %arg8: memref<16x128xf32, #tpu.memory_space<vmem>>) attributes {dimension_semantics = [#tpu.dimension_semantics<parallel>], iteration_bounds = array<i64: 1>, scalar_prefetch = 0 : i64, scratch_operands = 0 : i64, tpu.core_type = #tpu.core_type<tc>, window_params = [{transform_indices = @transform_0, window_bounds = array<i64: 16, 32>}, {pipeline_mode = #tpu.pipeline_mode<synchronous>, transform_indices = @transform_1, window_bounds = array<i64: 32, 64>}, {pipeline_mode = #tpu.pipeline_mode<synchronous>, transform_indices = @transform_2, window_bounds = array<i64: 1, 64>}, {pipeline_mode = #tpu.pipeline_mode<synchronous>, transform_indices = @transform_3, window_bounds = array<i64: 64, 32>}, {pipeline_mode = #tpu.pipeline_mode<synchronous>, transform_indices = @transform_4, window_bounds = array<i64: 1, 32>}, {pipeline_mode = #tpu.pipeline_mode<synchronous>, transform_indices = @transform_5, window_bounds = array<i64: 32, 128>}, {pipeline_mode = #tpu.pipeline_mode<synchronous>, transform_indices = @transform_6, window_bounds = array<i64: 1, 128>}, {transform_indices = @transform_7, window_bounds = array<i64: 16, 128>}]} {
    %c0 = arith.constant 0 : index
    %c0_0 = arith.constant 0 : index
    %0 = vector.load %arg1[%c0, %c0_0] : memref<16x32xf32, #tpu.memory_space<vmem>>, vector<16x32xf32>
    %c0_1 = arith.constant 0 : index
    %c0_2 = arith.constant 0 : index
    %1 = vector.load %arg2[%c0_1, %c0_2] : memref<32x64xf32, #tpu.memory_space<vmem>>, vector<32x64xf32>
    %cst = arith.constant dense<0.000000e+00> : vector<16x64xf32>
    %2 = tpu.matmul %0, %1, %cst {dimension_numbers = #tpu.dot_dimension_numbers<[1], [0], [0], [1], [0, 0, 1, 1], [], []>} : vector<16x32xf32>, vector<32x64xf32>, vector<16x64xf32> -> vector<16x64xf32>
    %c0_3 = arith.constant 0 : index
    %c0_4 = arith.constant 0 : index
    %3 = vector.load %arg3[%c0_3, %c0_4] : memref<1x64xf32, #tpu.memory_space<vmem>>, vector<1x64xf32>
    %4 = vector.broadcast %3 : vector<1x64xf32> to vector<16x64xf32>
    %5 = arith.addf %2, %4 : vector<16x64xf32>
    %cst_5 = arith.constant 5.000000e-01 : f32
    %6 = vector.broadcast %cst_5 : f32 to vector<16x64xf32>
    %7 = arith.mulf %6, %5 : vector<16x64xf32>
    %cst_6 = arith.constant 0.707106769 : f32
    %8 = vector.broadcast %cst_6 : f32 to vector<16x64xf32>
    %9 = arith.mulf %5, %8 : vector<16x64xf32>
    %10 = math.erf %9 : vector<16x64xf32>
    %cst_7 = arith.constant 1.000000e+00 : f32
    %11 = vector.broadcast %cst_7 : f32 to vector<16x64xf32>
    %12 = arith.addf %11, %10 : vector<16x64xf32>
    %13 = arith.mulf %7, %12 : vector<16x64xf32>
    %c0_8 = arith.constant 0 : index
    %c0_9 = arith.constant 0 : index
    %14 = vector.load %arg4[%c0_8, %c0_9] : memref<64x32xf32, #tpu.memory_space<vmem>>, vector<64x32xf32>
    %cst_10 = arith.constant dense<0.000000e+00> : vector<16x32xf32>
    %15 = tpu.matmul %13, %14, %cst_10 {dimension_numbers = #tpu.dot_dimension_numbers<[1], [0], [0], [1], [0, 0, 1, 1], [], []>} : vector<16x64xf32>, vector<64x32xf32>, vector<16x32xf32> -> vector<16x32xf32>
    %c0_11 = arith.constant 0 : index
    %c0_12 = arith.constant 0 : index
    %16 = vector.load %arg5[%c0_11, %c0_12] : memref<1x32xf32, #tpu.memory_space<vmem>>, vector<1x32xf32>
    %17 = vector.broadcast %16 : vector<1x32xf32> to vector<16x32xf32>
    %18 = arith.addf %15, %17 : vector<16x32xf32>
    %cst_13 = arith.constant dense<0.000000e+00> : vector<16xf32>
    %19 = vector.multi_reduction <add>, %18, %cst_13 [1] : vector<16x32xf32> to vector<16xf32>
    %20 = vector.shape_cast %19 : vector<16xf32> to vector<16x1xf32>
    %cst_14 = arith.constant 3.200000e+01 : f32
    %21 = vector.broadcast %cst_14 : f32 to vector<16x1xf32>
    %22 = arith.divf %20, %21 : vector<16x1xf32>
    %23 = vector.broadcast %22 : vector<16x1xf32> to vector<16x32xf32>
    %24 = arith.subf %18, %23 : vector<16x32xf32>
    %25 = arith.mulf %24, %24 : vector<16x32xf32>
    %cst_15 = arith.constant dense<0.000000e+00> : vector<16xf32>
    %26 = vector.multi_reduction <add>, %25, %cst_15 [1] : vector<16x32xf32> to vector<16xf32>
    %27 = vector.shape_cast %26 : vector<16xf32> to vector<16x1xf32>
    %cst_16 = arith.constant 3.200000e+01 : f32
    %28 = vector.broadcast %cst_16 : f32 to vector<16x1xf32>
    %29 = arith.divf %27, %28 : vector<16x1xf32>
    %cst_17 = arith.constant 9.99999974E-6 : f32
    %30 = vector.broadcast %cst_17 : f32 to vector<16x1xf32>
    %31 = arith.addf %29, %30 : vector<16x1xf32>
    %32 = math.rsqrt %31 : vector<16x1xf32>
    %33 = vector.broadcast %32 : vector<16x1xf32> to vector<16x32xf32>
    %34 = arith.mulf %24, %33 : vector<16x32xf32>
    %c0_18 = arith.constant 0 : index
    %c0_19 = arith.constant 0 : index
    %35 = vector.load %arg6[%c0_18, %c0_19] : memref<32x128xf32, #tpu.memory_space<vmem>>, vector<32x128xf32>
    %cst_20 = arith.constant dense<0.000000e+00> : vector<16x128xf32>
    %36 = tpu.matmul %34, %35, %cst_20 {dimension_numbers = #tpu.dot_dimension_numbers<[1], [0], [0], [1], [0, 0, 1, 1], [], []>} : vector<16x32xf32>, vector<32x128xf32>, vector<16x128xf32> -> vector<16x128xf32>
    %c0_21 = arith.constant 0 : index
    %c0_22 = arith.constant 0 : index
    %37 = vector.load %arg7[%c0_21, %c0_22] : memref<1x128xf32, #tpu.memory_space<vmem>>, vector<1x128xf32>
    %38 = vector.broadcast %37 : vector<1x128xf32> to vector<16x128xf32>
    %39 = arith.addf %36, %38 : vector<16x128xf32>
    %c0_23 = arith.constant 0 : index
    %c0_24 = arith.constant 0 : index
    %40 = vector.load %arg8[%c0_23, %c0_24] : memref<16x128xf32, #tpu.memory_space<vmem>>, vector<16x128xf32>
    tpu.vector_store %arg8[%c0_23, %c0_24], %39 {strides = array<i32>} : memref<16x128xf32, #tpu.memory_space<vmem>>, vector<16x128xf32>,
    return
  }
  func.func @transform_0(%arg0: i32) -> (i32, i32) {
    %c0_i32 = arith.constant 0 : i32
    %c0_i32_0 = arith.constant 0 : i32
    return %arg0, %c0_i32 : i32, i32
  }
  func.func @transform_1(%arg0: i32) -> (i32, i32) {
    %c0_i32 = arith.constant 0 : i32
    %c0_i32_0 = arith.constant 0 : i32
    %c0_i32_1 = arith.constant 0 : i32
    return %c0_i32, %c0_i32_0 : i32, i32
  }
  func.func @transform_2(%arg0: i32) -> (i32, i32) {
    %c0_i32 = arith.constant 0 : i32
    %c0_i32_0 = arith.constant 0 : i32
    %c0_i32_1 = arith.constant 0 : i32
    return %c0_i32, %c0_i32_0 : i32, i32
  }
  func.func @transform_3(%arg0: i32) -> (i32, i32) {
    %c0_i32 = arith.constant 0 : i32
    %c0_i32_0 = arith.constant 0 : i32
    %c0_i32_1 = arith.constant 0 : i32
    return %c0_i32, %c0_i32_0 : i32, i32
  }
  func.func @transform_4(%arg0: i32) -> (i32, i32) {
    %c0_i32 = arith.constant 0 : i32
    %c0_i32_0 = arith.constant 0 : i32
    %c0_i32_1 = arith.constant 0 : i32
    return %c0_i32, %c0_i32_0 : i32, i32
  }
  func.func @transform_5(%arg0: i32) -> (i32, i32) {
    %c0_i32 = arith.constant 0 : i32
    %c0_i32_0 = arith.constant 0 : i32
    %c0_i32_1 = arith.constant 0 : i32
    return %c0_i32, %c0_i32_0 : i32, i32
  }
  func.func @transform_6(%arg0: i32) -> (i32, i32) {
    %c0_i32 = arith.constant 0 : i32
    %c0_i32_0 = arith.constant 0 : i32
    %c0_i32_1 = arith.constant 0 : i32
    return %c0_i32, %c0_i32_0 : i32, i32
  }
  func.func @transform_7(%arg0: i32) -> (i32, i32) {
    %c0_i32 = arith.constant 0 : i32
    %c0_i32_0 = arith.constant 0 : i32
    return %arg0, %c0_i32 : i32, i32
  }
}

</mosaic_0001>

<bundles_post_ra>
// kernel: tpu_custom_call.1
= control target key start
LH: loop header
LB: loop body
LE: loop exit
PB: predicated region body
PF: predicated region fallthrough
CT: control target
= control target key end

     0   :  { %vm40_vm0 = vcmask 261120   ;;  %s588_s0 = inlined_call_operand.vmem [shape: f32[16,32], index: 0, kind: input, shape index: {}]   ;;  %s589_s1 = inlined_call_operand.vmem [shape: f32[32,64], index: 1, kind: input, shape index: {}]   ;;  %s590_s2 = inlined_call_operand.vmem [shape: f32[1,64], index: 2, kind: input, shape index: {}]   ;;  %s591_s3 = inlined_call_operand.vmem [shape: f32[64,32], index: 3, kind: input, shape index: {}]   ;;  %s592_s4 = inlined_call_operand.vmem [shape: f32[1,32], index: 4, kind: input, shape index: {}]   ;;  %s593_s5 = inlined_call_operand.vmem [shape: f32[32,128], index: 5, kind: input, shape index: {}]   ;;  %s594_s6 = inlined_call_operand.vmem [shape: f32[1,128], index: 6, kind: input, shape index: {}]   ;;  %s595_s7 = inlined_call_operand.hbm [shape: f32[16,128], index: 7, kind: output, shape index: {}]  }
   0x1   :  { %v32_v0 = vld [vmem:[%s589_s1 + $0x18] sm:$0xff]  ;;  %v31_v1 = vld [vmem:[%s589_s1 + $0x10] sm:$0xff]  ;;  %v27_v2 = vld [vmem:[%s588_s0] sm:$0xff] }
   0x2   :  { %397 = vmatprep.subr.mxu0 %v32_v0  ;;  %v30_v3 = vld [vmem:[%s589_s1 + $0x8] sm:$0xff]  ;;  %405 = vmatprep.mubr.msk.f32.mxu0 %vm40_vm0, %v27_v2 }
   0x3   :  { %398 = vmatpush3.msra.mxu0 %v32_v0 }
   0x4   :  { %12 = vsyncpa [#allocation3], 0  ;;  %399 = vmatprep.subr.mxu0 %v31_v1  ;;  %v29_v4 = vld [vmem:[%s589_s1] sm:$0xff]  ;;  %v28_v5 = vld [vmem:[%s588_s0 + $0x8] sm:$0xff]  ;;  %vm147_vm1 = vcmask 523264   ;;  %s471_s14 = smov [#allocation2]  }
   0x5   :  { %400 = vmatpush3.msra.mxu0 %v31_v1  ;;  %v139_v6 = vld [vmem:[%s591_s3 + $0x38] sm:$0xff]  ;;  %v138_v7 = vld [vmem:[%s591_s3 + $0x30] sm:$0xff]  ;;  %v137_v8 = vld [vmem:[%s591_s3 + $0x28] sm:$0xff]  ;;  %s355_s15 = sshll.u32 %s471_s14, 4  ;;  %s356_s15 = int_to_ptr.vmem [resolvable:$true] %s355_s15 }
   0x6   :  { %401 = vmatprep.subr.mxu0 %v30_v3  ;;  %408 = vmatprep.subr.mxu1 %v139_v6  ;;  %v136_v9 = vld [vmem:[%s591_s3 + $0x20] sm:$0xff]  ;;  %v135_v10 = vld [vmem:[%s591_s3 + $0x18] sm:$0xff]  ;;  %v134_v11 = vld [vmem:[%s591_s3 + $0x10] sm:$0xff]  ;;  %s449_s16 = scalar_lea.vmem %s356_s15, 256  ;;  %p454_p1 = scmp.lt.s32.totalorder %s356_s15, %s356_s15 }
   0x7   :  { %402 = vmatpush3.msra.mxu0 %v30_v3  ;;  %409 = vmatpush3.msra.mxu1 %v139_v6  ;;  %v133_v12 = vld [vmem:[%s591_s3 + $0x8] sm:$0xff]  ;;  %v132_v13 = vld [vmem:[%s591_s3] sm:$0xff]  ;;  %v259_v46 = vld [vmem:[%s593_s5 + $0x18] sm:$0xff]  ;;  %p450_p0 = scmp.ne.s32.totalorder %s356_s15, %s449_s16  ;;  %p455_p2 = scmp.lt.s32.totalorder %s449_s16, %s449_s16 }
   0x8   :  { %403 = vmatprep.subr.mxu0 %v29_v4  ;;  %410 = vmatprep.subr.mxu1 %v138_v7  ;;  %v366_v14 = vld [vmem:[%s590_s2] ss:$0 sm:$0xff]  ;;  %v258_v47 = vld [vmem:[%s593_s5 + $0x10] sm:$0xff]  ;;  %v257_v48 = vld [vmem:[%s593_s5 + $0x8] sm:$0xff] }
   0x9   :  { %404 = vmatpush3.msra.mxu0 %v29_v4  ;;  %411 = vmatpush3.msra.mxu1 %v138_v7  ;;  %v369_v30 = vld [vmem:[%s592_s4] ss:$0 sm:$0xff]  ;;  %p456_p3 = por %p455_p2, %p454_p1 }
   0xa   :  { %406 = vmatmul.mubr.msk.f32.vlgmr.msra.gmra.mxu0 %vm40_vm0, %v28_v5  ;;  %412 = vmatprep.subr.mxu1 %v137_v8  ;;  %v256_v49 = vld [vmem:[%s593_s5] sm:$0xff] }
   0xb   :  { %413 = vmatpush3.msra.mxu1 %v137_v8  ;;  %427 = vmatprep.subr.mxu0 %v259_v46  ;;  %v372_v60 = vld [vmem:[%s594_s6] ss:$0 sm:$0xff]  ;;  %p457_p4 = pnand %p456_p3, %p450_p0 }
   0xc   :  { %414 = vmatprep.subr.mxu1 %v136_v9  ;;  %428 = vmatpush3.msra.mxu0 %v259_v46 }
   0xd   :  { %415 = vmatpush3.msra.mxu1 %v136_v9  ;;  %429 = vmatprep.subr.mxu0 %v258_v47 }
   0xe   :  { %416 = vmatprep.subr.mxu1 %v135_v10  ;;  %430 = vmatpush3.msra.mxu0 %v258_v47 }
   0xf   :  { %417 = vmatpush3.msra.mxu1 %v135_v10  ;;  %431 = vmatprep.subr.mxu0 %v257_v48 }
  0x10   :  { %418 = vmatprep.subr.mxu1 %v134_v11  ;;  %432 = vmatpush3.msra.mxu0 %v257_v48 }
  0x11   :  { %419 = vmatpush3.msra.mxu1 %v134_v11  ;;  %433 = vmatprep.subr.mxu0 %v256_v49 }
  0x12   :  { %420 = vmatprep.subr.mxu1 %v133_v12  ;;  %434 = vmatpush3.msra.mxu0 %v256_v49 }
  0x13   :  { %421 = vmatpush3.msra.mxu1 %v133_v12 }
  0x14   :  { %422 = vmatprep.subr.mxu1 %v132_v13 }
  0x15   :  { %423 = vmatpush3.msra.mxu1 %v132_v13 }
  0xca   :  { %v407_v15 = vpop.f32.mrf.mxu0 }
  0xcb   :  { %v119_v16 = vadd.f32 %v407_v15, %v366_v14 }
  0xcc   :  { %v113_v17 = vpop.f32.mrf.mxu0 }
  0xcd   :  { %v125_v18 = vmul.f32 0.70710677, %v119_v16  ;;  %v114_v19 = vadd.f32 %v366_v14, %v113_v17  ;;  %v123_v26 = vmul.f32 0.5, %v119_v16 }
  0xcf   :  { %441 = verf.f32 %v125_v18  ;;  %v124_v20 = vmul.f32 0.70710677, %v114_v19  ;;  %v122_v24 = vmul.f32 0.5, %v114_v19 }
  0xd1   :  { %443 = verf.f32 %v124_v20 }
  0xdc   :  { %v442_v21 = vpop.eup %441 }
  0xdd   :  { %v129_v23 = vadd.f32 1.0, %v442_v21 }
  0xde   :  { %v444_v22 = vpop.eup %443 }
  0xdf   :  { %v128_v25 = vadd.f32 1.0, %v444_v22  ;;  %v131_v28 = vmul.f32 %v129_v23, %v123_v26 }
  0xe1   :  { %v130_v27 = vmul.f32 %v128_v25, %v122_v24 }
  0xe3   :  { %424 = vmatprep.mubr.msk.f32.mxu1 %vm147_vm1, %v130_v27 }
  0xe4   :  { %425 = vmatmul.mubr.msk.f32.vlgmr.msra.gmra.mxu1 %vm147_vm1, %v131_v28 }
 0x1a4   :  { %v426_v29 = vpop.f32.mrf.mxu1 }
 0x1a5   :  { %v226_v33 = vadd.f32 %v426_v29, %v369_v30 }
 0x1a6   :  { %v220_v31 = vpop.f32.mrf.mxu1 }
 0x1a7   :  { %v221_v32 = vadd.f32 %v369_v30, %v220_v31  ;;  %v232_v35 = vsel %vm40_vm0, %v226_v33, 0.0 }
 0x1a9   :  { %v229_v34 = vsel %vm40_vm0, %v221_v32, 0.0 }
 0x1aa   :  { %230 = vadd.xlane.f32.xlu0 %v229_v34 }
 0x1ae   :  { %233 = vadd.xlane.f32.xlu0 %v232_v35 }
 0x233   :  { %v231_v36 = vpop.xlane.xlu0 %230 }
 0x234   :  { %v236_v37 = vmul.f32 0.03125, %v231_v36 }
 0x236   :  { %v238_v38 = vsub.f32 %v221_v32, %v236_v37 }
 0x237   :  { %v234_v39 = vpop.xlane.xlu0 %233 }
 0x238   :  { %v237_v40 = vmul.f32 0.03125, %v234_v39  ;;  %v240_v41 = vmul.f32 %v238_v38, %v238_v38 }
 0x23a   :  { %v239_v42 = vsub.f32 %v226_v33, %v237_v40  ;;  %v242_v43 = vsel %vm40_vm0, %v240_v41, 0.0 }
 0x23b   :  { %243 = vadd.xlane.f32.xlu1 %v242_v43 }
 0x23c   :  { %v241_v44 = vmul.f32 %v239_v42, %v239_v42 }
 0x23e   :  { %v245_v45 = vsel %vm40_vm0, %v241_v44, 0.0 }
 0x23f   :  { %246 = vadd.xlane.f32.xlu1 %v245_v45 }
 0x2c4   :  { %v244_v50 = vpop.xlane.xlu1 %243 }
 0x2c5   :  { %v248_v51 = vmul.f32 0.03125, %v244_v50 }
 0x2c7   :  { %v250_v52 = vadd.f32 1e-05, %v248_v51 }
 0x2c8   :  { %v247_v53 = vpop.xlane.xlu1 %246 }
 0x2c9   :  { %445 = vrsqrt.f32 %v250_v52  ;;  %v249_v54 = vmul.f32 0.03125, %v247_v53 }
 0x2cb   :  { %v251_v55 = vadd.f32 1e-05, %v249_v54 }
 0x2cd   :  { %447 = vrsqrt.f32 %v251_v55 }
 0x2d6   :  { %v446_v56 = vpop.eup %445 }
 0x2d7   :  { %v254_v57 = vmul.f32 %v446_v56, %v238_v38 }
 0x2d9   :  { %435 = vmatprep.mubr.msk.f32.mxu0 %vm40_vm0, %v254_v57 }
 0x2da   :  { %v448_v58 = vpop.eup %447 }
 0x2db   :  { %v255_v59 = vmul.f32 %v448_v58, %v239_v42 }
 0x2dd   :  { %436 = vmatmul.mubr.msk.f32.vlgmr.msra.gmra.mxu0 %vm40_vm0, %v255_v59 }
 0x39d   :  { %v437_v61 = vpop.f32.mrf.mxu0 }
 0x39e   :  { %v345_v62 = vadd.f32 %v437_v61, %v372_v60 }
 0x39f   :  { %v339_v63 = vpop.f32.mrf.mxu0 }
 0x3a0   :  { %349 = vst [vmem:[#allocation2 + $0x8] sm:$0xff] %v345_v62  ;;  %v340_v0 = vadd.f32 %v372_v60, %v339_v63 }
 0x3a2   :  { %348 = vst [vmem:[#allocation2] sm:$0xff] %v340_v0 }
 0x3a3   :  { %460 = shalt.err (!%p457_p4)
}
 0x3a4   :  { %s472_s1 = smov 128   ;;  %s473_s17 = smov 8  }
 0x3a5   :  { %361 = dma.vmem_to_hbm [thread:$0]  %s356_s15, 256, %s595_s7, [#allocation3], %s472_s1, %s472_s1, %s473_s17  }
 0x3a6   :  { %469 = dma.done.wait [#allocation3], 256  }
 0x3a7   :  { %470 = vsyncadd [#allocation3], 4294967040 }
 0x3a8   :  { %365 = vsyncpa [#allocation3], 1 }

</bundles_post_ra>
